<compile_context>
chip_gen: v7x
topology: tpu7x:2x2x1
jax: 0.10.0
libtpu: 0.0.40
codegen_flags: <defaults>
</compile_context>

<pallas_src>
import functools

import jax
import jax.numpy as jnp
from jax.experimental import pallas as pl
from jax.experimental.pallas import tpu as pltpu


def _round_up(x, m):
    return ((x + m - 1) // m) * m


def bnn_kernel(x_ref, w1_ref, b1_ref, wh_ref, bh_ref, mean_ref, var_ref, *,
               d_out):
    # fc1: cast the x tile to bf16 in-kernel (VPU), MXU matmul with f32
    # accumulation, fused bias + relu.
    h = jnp.maximum(
        jnp.dot(x_ref[...].astype(w1_ref.dtype), w1_ref[...],
                preferred_element_type=jnp.float32)
        + b1_ref[...],
        0.0,
    )

    # Fused heads: single MXU pass producing [mean | log_var | zero-pad]
    # packed along lanes; bias add in f32.
    z = (
        jnp.dot(h.astype(wh_ref.dtype), wh_ref[...],
                preferred_element_type=jnp.float32)
        + bh_ref[...]
    )

    # Narrow stores: mean lanes as-is, exp() only on the log-variance lanes.
    mean_ref[...] = z[:, :d_out]
    var_ref[...] = jnp.exp(z[:, d_out:2 * d_out])


def prepare_params(params, compute_dtype=jnp.bfloat16):
    """One-time weight prep: pack both heads lane-adjacently and cast MXU
    inputs to bf16.  Call once at init, not per forward."""
    w1, b1 = params["w1"], params["b1"]      # (D_in, H),  (1, H)
    wm, bm = params["wm"], params["bm"]      # (H, D_out), (1, D_out)
    wv, bv = params["wv"], params["bv"]      # (H, D_out), (1, D_out)

    H, d_out = wm.shape
    n_pad = max(128, _round_up(2 * d_out, 128))  # lane-dense weight slab

    w_heads = jnp.zeros((H, n_pad), jnp.float32)
    w_heads = w_heads.at[:, :d_out].set(wm).at[:, d_out:2 * d_out].set(wv)
    b_heads = jnp.zeros((1, n_pad), jnp.float32)
    b_heads = b_heads.at[:, :d_out].set(bm).at[:, d_out:2 * d_out].set(bv)

    return {
        "w1": w1.astype(compute_dtype),       # bf16 MXU input
        "b1": b1,                             # f32 (VPU)
        "w_heads": w_heads.astype(compute_dtype),
        "b_heads": b_heads,                   # f32 (VPU)
        "d_out": int(d_out),                  # static
    }


@functools.partial(jax.jit, static_argnames=("d_out", "block_b"))
def bnn_forward(x, w1, b1, w_heads, b_heads, *, d_out, block_b=4096):
    """x: (B, D_in) float32.  Weights pre-packed by prepare_params()."""
    B, D_in = x.shape
    H = w1.shape[1]
    n_pad = w_heads.shape[1]

    # Batch tile: as large as block_b, but split into >=2 balanced tiles when
    # possible so both v7x TensorCores get work (neutral on v5e/v6e).
    blk_b = min(block_b, _round_up(pl.cdiv(B, 2), 8))
    if blk_b > B:
        blk_b = B          # tiny batches: one block equal to the full batch
    grid = (pl.cdiv(B, blk_b),)   # partial final block is masked by Pallas

    mean, var = pl.pallas_call(
        functools.partial(bnn_kernel, d_out=d_out),
        out_shape=(
            jax.ShapeDtypeStruct((B, d_out), jnp.float32),
            jax.ShapeDtypeStruct((B, d_out), jnp.float32),
        ),
        grid_spec=pl.GridSpec(
            grid=grid,
            in_specs=[
                pl.BlockSpec((blk_b, D_in), lambda i: (i, 0)),   # x tile
                pl.BlockSpec((D_in, H), lambda i: (0, 0)),       # W1 resident
                pl.BlockSpec((1, H), lambda i: (0, 0)),          # b1 resident
                pl.BlockSpec((H, n_pad), lambda i: (0, 0)),      # W_heads
                pl.BlockSpec((1, n_pad), lambda i: (0, 0)),      # b_heads
            ],
            out_specs=(
                pl.BlockSpec((blk_b, d_out), lambda i: (i, 0)),  # mean
                pl.BlockSpec((blk_b, d_out), lambda i: (i, 0)),  # variance
            ),
        ),
        compiler_params=pltpu.CompilerParams(
            dimension_semantics=("parallel",),
            vmem_limit_bytes=32 * 1024 * 1024,   # keeps big tiles OK on v5e
        ),
    )(x, w1, b1, w_heads, b_heads)
    return mean, var


def init_params(key, input_dim, output_dim, hidden_dim=64):
    """Deterministic synthetic parameters (stored as (in, out) matrices)."""
    ks = jax.random.split(key, 6)
    scale1 = 1.0 / jnp.sqrt(input_dim)
    scale2 = 1.0 / jnp.sqrt(hidden_dim)
    return {
        "w1": jax.random.uniform(ks[0], (input_dim, hidden_dim),
                                 jnp.float32, -scale1, scale1),
        "b1": jax.random.uniform(ks[1], (1, hidden_dim),
                                 jnp.float32, -scale1, scale1),
        "wm": jax.random.uniform(ks[2], (hidden_dim, output_dim),
                                 jnp.float32, -scale2, scale2),
        "bm": jax.random.uniform(ks[3], (1, output_dim),
                                 jnp.float32, -scale2, scale2),
        "wv": jax.random.uniform(ks[4], (hidden_dim, output_dim),
                                 jnp.float32, -scale2, scale2),
        "bv": jax.random.uniform(ks[5], (1, output_dim),
                                 jnp.float32, -scale2, scale2),
    }


if __name__ == "__main__":
    key = jax.random.PRNGKey(0)
    k_x, k_p = jax.random.split(key)

    batch, input_dim, hidden_dim, output_dim = 8, 16, 64, 4

    x = jax.random.normal(k_x, (batch, input_dim), jnp.float32)
    params = init_params(k_p, input_dim, output_dim, hidden_dim)
    prepped = prepare_params(params)   # one-time weight packing / bf16 cast

    mean, var = bnn_forward(x, prepped["w1"], prepped["b1"],
                            prepped["w_heads"], prepped["b_heads"],
                            d_out=prepped["d_out"])
    jax.block_until_ready((mean, var))

    # Reference in plain JAX, mirroring the kernel's bf16-input / f32-acc
    # numerics (same math as the PyTorch forward).
    f32 = jnp.float32
    cdt = jnp.bfloat16
    xw = x.astype(cdt).astype(f32)
    w1w = params["w1"].astype(cdt).astype(f32)
    wmw = params["wm"].astype(cdt).astype(f32)
    wvw = params["wv"].astype(cdt).astype(f32)
    h_ref = jnp.maximum(xw @ w1w + params["b1"], 0.0)
    h_ref = h_ref.astype(cdt).astype(f32)
    mean_ref = h_ref @ wmw + params["bm"]
    var_ref = jnp.exp(h_ref @ wvw + params["bv"])

    assert jnp.allclose(mean, mean_ref, atol=2e-2, rtol=2e-2)
    assert jnp.allclose(var, var_ref, atol=2e-2, rtol=2e-2)

    print("KERNEL_OK")
</pallas_src>

<mosaic_0001>
module attributes {stable_mosaic.version = 11 : i64} {
  func.func @bnn_kernel(%arg0: i32, %arg1: memref<8x16xf32, #tpu.memory_space<vmem>>, %arg2: memref<16x64xbf16, #tpu.memory_space<vmem>>, %arg3: memref<1x64xf32, #tpu.memory_space<vmem>>, %arg4: memref<64x128xbf16, #tpu.memory_space<vmem>>, %arg5: memref<1x128xf32, #tpu.memory_space<vmem>>, %arg6: memref<8x4xf32, #tpu.memory_space<vmem>>, %arg7: memref<8x4xf32, #tpu.memory_space<vmem>>) attributes {dimension_semantics = [#tpu.dimension_semantics<parallel>], iteration_bounds = array<i64: 1>, scalar_prefetch = 0 : i64, scratch_operands = 0 : i64, tpu.core_type = #tpu.core_type<tc>, window_params = [{transform_indices = @transform_0, window_bounds = array<i64: 8, 16>}, {pipeline_mode = #tpu.pipeline_mode<synchronous>, transform_indices = @transform_1, window_bounds = array<i64: 16, 64>}, {pipeline_mode = #tpu.pipeline_mode<synchronous>, transform_indices = @transform_2, window_bounds = array<i64: 1, 64>}, {pipeline_mode = #tpu.pipeline_mode<synchronous>, transform_indices = @transform_3, window_bounds = array<i64: 64, 128>}, {pipeline_mode = #tpu.pipeline_mode<synchronous>, transform_indices = @transform_4, window_bounds = array<i64: 1, 128>}, {transform_indices = @transform_5, window_bounds = array<i64: 8, 4>}, {transform_indices = @transform_6, window_bounds = array<i64: 8, 4>}]} {
    %c0 = arith.constant 0 : index
    %c0_0 = arith.constant 0 : index
    %0 = vector.load %arg1[%c0, %c0_0] : memref<8x16xf32, #tpu.memory_space<vmem>>, vector<8x16xf32>
    %1 = arith.truncf %0 : vector<8x16xf32> to vector<8x16xbf16>
    %c0_1 = arith.constant 0 : index
    %c0_2 = arith.constant 0 : index
    %2 = vector.load %arg2[%c0_1, %c0_2] : memref<16x64xbf16, #tpu.memory_space<vmem>>, vector<16x64xbf16>
    %cst = arith.constant dense<0.000000e+00> : vector<8x64xf32>
    %3 = tpu.matmul %1, %2, %cst {dimension_numbers = #tpu.dot_dimension_numbers<[1], [0], [0], [1], [0, 0, 1, 1], [], []>} : vector<8x16xbf16>, vector<16x64xbf16>, vector<8x64xf32> -> vector<8x64xf32>
    %c0_3 = arith.constant 0 : index
    %c0_4 = arith.constant 0 : index
    %4 = vector.load %arg3[%c0_3, %c0_4] : memref<1x64xf32, #tpu.memory_space<vmem>>, vector<1x64xf32>
    %5 = vector.broadcast %4 : vector<1x64xf32> to vector<8x64xf32>
    %6 = arith.addf %3, %5 : vector<8x64xf32>
    %cst_5 = arith.constant 0.000000e+00 : f32
    %7 = vector.broadcast %cst_5 : f32 to vector<8x64xf32>
    %8 = arith.maximumf %6, %7 : vector<8x64xf32>
    %9 = arith.truncf %8 : vector<8x64xf32> to vector<8x64xbf16>
    %c0_6 = arith.constant 0 : index
    %c0_7 = arith.constant 0 : index
    %10 = vector.load %arg4[%c0_6, %c0_7] : memref<64x128xbf16, #tpu.memory_space<vmem>>, vector<64x128xbf16>
    %cst_8 = arith.constant dense<0.000000e+00> : vector<8x128xf32>
    %11 = tpu.matmul %9, %10, %cst_8 {dimension_numbers = #tpu.dot_dimension_numbers<[1], [0], [0], [1], [0, 0, 1, 1], [], []>} : vector<8x64xbf16>, vector<64x128xbf16>, vector<8x128xf32> -> vector<8x128xf32>
    %c0_9 = arith.constant 0 : index
    %c0_10 = arith.constant 0 : index
    %12 = vector.load %arg5[%c0_9, %c0_10] : memref<1x128xf32, #tpu.memory_space<vmem>>, vector<1x128xf32>
    %13 = vector.broadcast %12 : vector<1x128xf32> to vector<8x128xf32>
    %14 = arith.addf %11, %13 : vector<8x128xf32>
    %15 = vector.extract_strided_slice %14 {offsets = [0, 0], sizes = [8, 4], strides = [1, 1]} : vector<8x128xf32> to vector<8x4xf32>
    %c0_11 = arith.constant 0 : index
    %c0_12 = arith.constant 0 : index
    %16 = vector.load %arg6[%c0_11, %c0_12] : memref<8x4xf32, #tpu.memory_space<vmem>>, vector<8x4xf32>
    tpu.vector_store %arg6[%c0_11, %c0_12], %15 {strides = array<i32>} : memref<8x4xf32, #tpu.memory_space<vmem>>, vector<8x4xf32>,
    %17 = vector.extract_strided_slice %14 {offsets = [0, 4], sizes = [8, 4], strides = [1, 1]} : vector<8x128xf32> to vector<8x4xf32>
    %18 = math.exp %17 : vector<8x4xf32>
    %c0_13 = arith.constant 0 : index
    %c0_14 = arith.constant 0 : index
    %19 = vector.load %arg7[%c0_13, %c0_14] : memref<8x4xf32, #tpu.memory_space<vmem>>, vector<8x4xf32>
    tpu.vector_store %arg7[%c0_13, %c0_14], %18 {strides = array<i32>} : memref<8x4xf32, #tpu.memory_space<vmem>>, vector<8x4xf32>,
    return
  }
  func.func @transform_0(%arg0: i32) -> (i32, i32) {
    %c0_i32 = arith.constant 0 : i32
    %c0_i32_0 = arith.constant 0 : i32
    return %arg0, %c0_i32 : i32, i32
  }
  func.func @transform_1(%arg0: i32) -> (i32, i32) {
    %c0_i32 = arith.constant 0 : i32
    %c0_i32_0 = arith.constant 0 : i32
    %c0_i32_1 = arith.constant 0 : i32
    return %c0_i32, %c0_i32_0 : i32, i32
  }
  func.func @transform_2(%arg0: i32) -> (i32, i32) {
    %c0_i32 = arith.constant 0 : i32
    %c0_i32_0 = arith.constant 0 : i32
    %c0_i32_1 = arith.constant 0 : i32
    return %c0_i32, %c0_i32_0 : i32, i32
  }
  func.func @transform_3(%arg0: i32) -> (i32, i32) {
    %c0_i32 = arith.constant 0 : i32
    %c0_i32_0 = arith.constant 0 : i32
    %c0_i32_1 = arith.constant 0 : i32
    return %c0_i32, %c0_i32_0 : i32, i32
  }
  func.func @transform_4(%arg0: i32) -> (i32, i32) {
    %c0_i32 = arith.constant 0 : i32
    %c0_i32_0 = arith.constant 0 : i32
    %c0_i32_1 = arith.constant 0 : i32
    return %c0_i32, %c0_i32_0 : i32, i32
  }
  func.func @transform_5(%arg0: i32) -> (i32, i32) {
    %c0_i32 = arith.constant 0 : i32
    %c0_i32_0 = arith.constant 0 : i32
    return %arg0, %c0_i32 : i32, i32
  }
  func.func @transform_6(%arg0: i32) -> (i32, i32) {
    %c0_i32 = arith.constant 0 : i32
    %c0_i32_0 = arith.constant 0 : i32
    return %arg0, %c0_i32 : i32, i32
  }
}

</mosaic_0001>

<bundles_post_ra>
// kernel: bnn_forward.1
= control target key start
LH: loop header
LB: loop body
LE: loop exit
PB: predicated region body
PF: predicated region fallthrough
CT: control target
= control target key end

     0   :  { %12 = vsyncpa [#allocation3], 0  ;;  %s443_s0 = inlined_call_operand.hbm [shape: f32[8,16], index: 0, kind: input, shape index: {}]   ;;  %s444_s1 = inlined_call_operand.hbm [shape: bf16[16,64], index: 1, kind: input, shape index: {}]   ;;  %s445_s2 = inlined_call_operand.vmem [shape: f32[1,64], index: 2, kind: input, shape index: {}]   ;;  %s446_s3 = inlined_call_operand.hbm [shape: bf16[64,128], index: 3, kind: input, shape index: {}]   ;;  %s447_s4 = inlined_call_operand.vmem [shape: f32[1,128], index: 4, kind: input, shape index: {}]   ;;  %s448_s5 = inlined_call_operand.vmem [shape: f32[8,4], index: 5, kind: output, shape index: {0}]   ;;  %s449_s6 = inlined_call_operand.vmem [shape: f32[8,4], index: 6, kind: output, shape index: {1}]  }
   0x1   :  { %13 = vsyncpa [#allocation5], 0  ;;  %s346_s21 = smov [#allocation4]   ;;  %s276_s25 = scalar_lea.hbm %s444_s1, 128 }
   0x2   :  { %s29_s22 = sshll.u32 %s346_s21, 4  ;;  %p277_p0 = scmp.ne.s32.totalorder %s444_s1, %s276_s25  ;;  %s30_s22 = int_to_ptr.vmem [resolvable:$true] %s29_s22 }
   0x3   :  { %p280_p1 = scmp.lt.u32.totalorder %s276_s25, %s444_s1 }
   0x5   :  { %p282_p2 = pnand %p280_p1, %p277_p0 }
   0x7   :  { %285 = shalt.err (!%p282_p2)
}
   0x8   :  { %s286_s30 = scalar_lea.vmem %s30_s22, 128  ;;  %p291_p4 = scmp.lt.s32.totalorder %s30_s22, %s30_s22 }
   0x9   :  { %p287_p3 = scmp.ne.s32.totalorder %s30_s22, %s286_s30  ;;  %p292_p5 = scmp.lt.s32.totalorder %s286_s30, %s286_s30 }
   0xb   :  { %p293_p6 = por %p292_p5, %p291_p4 }
   0xd   :  { %p294_p7 = pnand %p293_p6, %p287_p3 }
   0xf   :  { %297 = shalt.err (!%p294_p7)
}
  0x10   :  { %s347_s7 = smov 64   ;;  %s348_s8 = smov 4  }
  0x11   :  { %35 = dma.hbm_to_vmem [thread:$0]  %s444_s1, 128, %s30_s22, [#allocation5], %s347_s7, %s347_s7, %s348_s8  }
  0x12   :  { %s349_s11 = smov [#allocation2]   ;;  %s350_s13 = smov [#allocation6]  }
  0x13   :  { %s20_s12 = sshll.u32 %s349_s11, 4  ;;  %s43_s14 = sshll.u32 %s350_s13, 4  ;;  %s21_s12 = int_to_ptr.vmem [resolvable:$true] %s20_s12  ;;  %s44_s14 = int_to_ptr.vmem [resolvable:$true] %s43_s14 }
  0x14   :  { %s298_s17 = scalar_lea.hbm %s443_s0, 128 }
  0x15   :  { %p299_p8 = scmp.ne.s32.totalorder %s443_s0, %s298_s17  ;;  %p302_p9 = scmp.lt.u32.totalorder %s298_s17, %s443_s0 }
  0x17   :  { %p304_p10 = pnand %p302_p9, %p299_p8 }
  0x19   :  { %307 = shalt.err (!%p304_p10)
}
  0x1a   :  { %s308_s1 = scalar_lea.vmem %s21_s12, 128  ;;  %p313_p12 = scmp.lt.s32.totalorder %s21_s12, %s21_s12 }
  0x1b   :  { %p309_p11 = scmp.ne.s32.totalorder %s21_s12, %s308_s1  ;;  %p314_p13 = scmp.lt.s32.totalorder %s308_s1, %s308_s1 }
  0x1d   :  { %p315_p0 = por %p314_p13, %p313_p12 }
  0x1f   :  { %p316_p1 = pnand %p315_p0, %p309_p11 }
  0x21   :  { %319 = shalt.err (!%p316_p1)
}
  0x22   :  { %23 = dma.hbm_to_vmem [thread:$0]  %s443_s0, 128, %s21_s12, [#allocation3]  }
  0x23   :  { %s320_s26 = scalar_lea.hbm %s446_s3, 512 }
  0x24   :  { %p321_p2 = scmp.ne.s32.totalorder %s446_s3, %s320_s26  ;;  %p324_p3 = scmp.lt.u32.totalorder %s320_s26, %s446_s3 }
  0x26   :  { %p326_p4 = pnand %p324_p3, %p321_p2 }
  0x28   :  { %329 = shalt.err (!%p326_p4)
}
  0x29   :  { %s330_s9 = scalar_lea.vmem %s44_s14, 512  ;;  %p335_p6 = scmp.lt.s32.totalorder %s44_s14, %s44_s14 }
  0x2a   :  { %p331_p5 = scmp.ne.s32.totalorder %s44_s14, %s330_s9  ;;  %p336_p7 = scmp.lt.s32.totalorder %s330_s9, %s330_s9 }
  0x2c   :  { %p337_p8 = por %p336_p7, %p335_p6 }
  0x2e   :  { %p338_p9 = pnand %p337_p8, %p331_p5 }
  0x30   :  { %341 = shalt.err (!%p338_p9)
}
  0x31   :  { %49 = dma.hbm_to_vmem [thread:$0]  %s446_s3, 512, %s44_s14, [#allocation5], %s347_s7, %s347_s7, %s348_s8  }
  0x32   :  { %342 = dma.done.wait [#allocation3], 128  }
  0x33   :  { %343 = vsyncadd [#allocation3], 4294967168 }
  0x34   :  { %344 = dma.done.wait [#allocation5], 640  }
  0x35   :  { %345 = vsyncadd [#allocation5], 4294966656  ;;  %v351_v0 = vmov 0.0   ;;  %vm352_vm0 = vmmov 0   ;;  %v269_v1 = vld [vmem:[#allocation4] sm:$0xff]   ;;  %v62_v2 = vld [vmem:[#allocation2] sm:$0xff] }
  0x36   :  { %243 = vmatprep.subr.bf16.mxu0 %v351_v0  ;;  %245 = vmatprep.mubr.msk.bf16.mxu0 %vm352_vm0, %v351_v0  ;;  %v63_v3 = vpack.c.bf16 %v62_v2, %v62_v2  ;;  %vm79_vm1 = vcmask 130048   ;;  %v270_v4 = vld [vmem:[#allocation6] sm:$0xff]   ;;  %v271_v5 = vld [vmem:[#allocation6 + $0x8] sm:$0xff]   ;;  %v272_v6 = vld [vmem:[#allocation6 + $0x10] sm:$0xff]   ;;  %vm164_vm2 = vcmask 523264   ;;  %vm208_vm3 = vcmask 31744  }
  0x37   :  { %249 = vmatprep.subr.bf16.mxu1 %v351_v0  ;;  %257 = vmatprep.mubr.msk.bf16.mxu1 %vm352_vm0, %v351_v0  ;;  %v273_v7 = vld [vmem:[#allocation6 + $0x18] sm:$0xff]   ;;  %v227_v8 = vld [vmem:[%s445_s2] ss:$0 sm:$0xff]  ;;  %s353_s13 = smov 124  }
  0x38   :  { %244 = vmatpush3.bf16.msra.mxu0 %v269_v1  ;;  %250 = vmatpush3.bf16.msra.mxu1 %v270_v4  ;;  %v230_v16 = vld [vmem:[%s447_s4] ss:$0 sm:$0xff] }
  0x39   :  { %251 = vmatprep.subr.bf16.mxu1 %v351_v0 }
  0x3b   :  { %246 = vmatmul.mubr.msk.bf16.vlgmr.msra.gmra.mrb[0].mxu0 %vm79_vm1, %v63_v3 }
  0x3c   :  { %252 = vmatpush3.bf16.msra.mxu1 %v271_v5 }
  0x3d   :  { %253 = vmatprep.subr.bf16.mxu1 %v351_v0 }
  0x40   :  { %254 = vmatpush3.bf16.msra.mxu1 %v272_v6 }
  0x41   :  { %255 = vmatprep.subr.bf16.mxu1 %v351_v0 }
  0x44   :  { %256 = vmatpush3.bf16.msra.mxu1 %v273_v7 }
 0x10e   :  { %v117_v9 = vpop.f32.mrb[0].mxu0 }
 0x10f   :  { %v118_v10 = vadd.f32 %v227_v8, %v117_v9  ;;  %v247_v11 = vpop.f32.mrb[1].mxu0 }
 0x110   :  { %v120_v12 = vpop.f32.mrb[2].mxu0 }
 0x111   :  { %v123_v13 = vmax.f32 %v118_v10, 0.0  ;;  %v248_v14 = vpop.f32.mrb[3].mxu0 }
 0x113   :  { %v124_v15 = vpack.c.bf16 %v123_v13, %v123_v13 }
 0x115   :  { %258 = vmatmul.mubr.msk.bf16.vlgmr.msra.gmra.mrb[0].mxu1 %vm164_vm2, %v124_v15 }
 0x1e8   :  { %v202_v17 = vpop.f32.mrb[0].mxu1 }
 0x1e9   :  { %v203_v18 = vadd.f32 %v230_v16, %v202_v17  ;;  %v259_v19 = vpop.f32.mrb[1].mxu1 }
 0x1ea   :  { %v205_v20 = vpop.f32.mrb[2].mxu1 }
 0x1eb   :  { %v210_v21 = vmul.f32 1.442695, %v203_v18  ;;  %v260_v22 = vpop.f32.mrb[3].mxu1  ;;  %209 = vst.msk [vmem:[%s448_s5] sm:$0xff] %vm208_vm3, %v203_v18 }
 0x1ed   :  { %274 = vpow2.f32 %v210_v21 }
 0x1f7   :  { %v275_v23 = vpop.eup %274 }
 0x1f8   :  { %213 = vrot.lane.b32.xlu0 %v275_v23, %s353_s13 }
 0x26a   :  { %v214_v24 = vpop.permute.xlu0 %213 }
 0x26b   :  { %216 = vst.msk [vmem:[%s449_s6] sm:$0xff] %vm208_vm3, %v214_v24 }
 0x26c   :  { %225 = vsyncpa [#allocation3], 1 }
 0x26d   :  { %226 = vsyncpa [#allocation5], 1 }

</bundles_post_ra>
